<compile_context>
chip_gen: v7x
topology: tpu7x:2x2x1
jax: 0.10.0
libtpu: 0.0.40
codegen_flags: <defaults>
</compile_context>

<pallas_src>
import functools

import jax
import jax.numpy as jnp
from jax.experimental import pallas as pl
from jax.experimental.pallas import tpu as pltpu

LN_EPS = 1e-5
VMEM_LIMIT = 64 * 1024 * 1024


# ------------------------------------------------------------------
# Small shared helpers
# ------------------------------------------------------------------

def _block_rows(m, target=1024):
    """Largest row-block <= target that is a multiple of 8 and divides m."""
    cap = min(m, target)
    for bm in range(cap, 7, -1):
        if m % bm == 0 and bm % 8 == 0:
            return bm
    return m


def _seq_block(n, target=128):
    """Query-tile size: multiple of 8 dividing n (<= target), else the full extent."""
    cap = min(n, target)
    for b in range(cap, 7, -1):
        if n % b == 0 and b % 8 == 0:
            return b
    return n


def _ln_core(z, gamma, beta):
    mu = jnp.mean(z, axis=-1, keepdims=True)
    var = jnp.mean((z - mu) ** 2, axis=-1, keepdims=True)
    return (z - mu) * jax.lax.rsqrt(var + LN_EPS) * gamma + beta


# ------------------------------------------------------------------
# Pallas kernels
# ------------------------------------------------------------------

def _qkv_kernel(x_ref, pos_ref, w_ref, b_ref, o_ref, *, d_model):
    """Fused q|k|v projection. q,k use x+pos; v uses x (nn.MultiheadAttention semantics)."""
    x = x_ref[...]
    xp = (x + pos_ref[...]).astype(jnp.bfloat16)
    xb = x.astype(jnp.bfloat16)
    w = w_ref[...]                                       # (D, 3D) bf16
    b = b_ref[...]                                       # (1, 3D) f32
    qk = jnp.dot(xp, w[:, :2 * d_model], preferred_element_type=jnp.float32) + b[:, :2 * d_model]
    v = jnp.dot(xb, w[:, 2 * d_model:], preferred_element_type=jnp.float32) + b[:, 2 * d_model:]
    o_ref[:, :2 * d_model] = qk
    o_ref[:, 2 * d_model:] = v


def _self_attn_kernel(qq_ref, kv_ref, tgt_ref, wo_ref, bo_ref, g_ref, beta_ref, o_ref, y_ref,
                      *, n_heads, d_model):
    """All heads of SDPA for one (batch, query-tile) + single fused out-proj + residual + LN."""
    dh = d_model // n_heads
    scale = 1.0 / float(dh) ** 0.5
    qq = qq_ref[0]                                       # (tq, 3D) f32  (query rows of this tile)
    kv = kv_ref[0]                                       # (Lq, 3D) f32  (full sequence)
    for h in range(n_heads):
        q = qq[:, h * dh:(h + 1) * dh].astype(jnp.bfloat16)
        k = kv[:, d_model + h * dh: d_model + (h + 1) * dh].astype(jnp.bfloat16)
        v = kv[:, 2 * d_model + h * dh: 2 * d_model + (h + 1) * dh].astype(jnp.bfloat16)
        s = jax.lax.dot_general(q, k, (((1,), (1,)), ((), ())),
                                preferred_element_type=jnp.float32) * scale
        s = s - jnp.max(s, axis=-1, keepdims=True)
        p = jnp.exp(s)
        p = p * pl.reciprocal(jnp.sum(p, axis=-1, keepdims=True), approx=True)
        y_ref[:, h * dh:(h + 1) * dh] = jnp.dot(p.astype(jnp.bfloat16), v,
                                                preferred_element_type=jnp.float32)
    z = (tgt_ref[0]
         + jnp.dot(y_ref[...].astype(jnp.bfloat16), wo_ref[...],
                   preferred_element_type=jnp.float32)
         + bo_ref[...])
    o_ref[0] = _ln_core(z, g_ref[...], beta_ref[...])


def _masked_linear_kernel(x_ref, keep_ref, w_ref, b_ref, o_ref):
    """value_proj with the padding mask fused in (keep = 1.0 for valid rows, 0.0 for padded)."""
    y = jnp.dot(x_ref[...], w_ref[...], preferred_element_type=jnp.float32) + b_ref[...]
    o_ref[...] = (y * keep_ref[...]).astype(o_ref.dtype)


def _off_attn_kernel(x_ref, pos_ref, w_ref, b_ref, g_ref, gt_ref, o_ref, *, n_heads, lp):
    """Fused sampling_offsets | attention_weights projection with a lane-dense per-head softmax:
    group sums / reciprocal broadcast done with tiny 0/1 matmuls, one dense store per slab."""
    xb = (x_ref[...] + pos_ref[...]).astype(jnp.bfloat16)
    raw = jnp.dot(xb, w_ref[...], preferred_element_type=jnp.float32) + b_ref[...]
    off_cols = 2 * n_heads * lp
    o_ref[:, :off_cols] = raw[:, :off_cols]
    a = raw[:, off_cols:]                                # (bm, H*lp)
    # Subtracting the per-row global max is a valid per-group softmax shift (constant per row).
    a = a - jnp.max(a, axis=-1, keepdims=True)
    e = jnp.exp(a)
    gsum = jax.lax.dot_general(e, g_ref[...], (((1,), (0,)), ((), ())),
                               preferred_element_type=jnp.float32,
                               precision=jax.lax.Precision.HIGHEST)        # (bm, H)
    inv = pl.reciprocal(jnp.maximum(gsum, 1e-30), approx=True)
    denom = jax.lax.dot_general(inv, gt_ref[...], (((1,), (0,)), ((), ())),
                                preferred_element_type=jnp.float32,
                                precision=jax.lax.Precision.HIGHEST)       # (bm, H*lp)
    o_ref[:, off_cols:] = e * denom


def _deform_agg_kernel(g_ref, w_ref, tgt_ref, wo_ref, bo_ref, gamma_ref, beta_ref, o_ref, y_ref,
                       *, n_heads):
    """Sparse deformable aggregation over K = L*P*4 gathered taps (lane-dense (tLq, K, D) layout,
    heads on the lane axis), fused with a single out-proj matmul + residual + LayerNorm."""
    gv = g_ref[0]                                        # (tLq, K, D) bf16
    w = w_ref[0]                                         # (tLq, K, H) f32
    d = gv.shape[-1]
    dh = d // n_heads
    # TODO(synk): the per-head dh-wide multiply could be made fully lane-dense by expanding w to
    # (tLq, K, D) with a 0/1 (H, D) expander matmul; kept per-head slices for lowering robustness.
    for h in range(n_heads):
        gh = gv[:, :, h * dh:(h + 1) * dh].astype(jnp.float32)   # (tLq, K, dh)
        wh = w[:, :, h:h + 1]                                    # (tLq, K, 1)
        y_ref[:, h * dh:(h + 1) * dh] = jnp.sum(gh * wh, axis=1)
    z = (tgt_ref[0]
         + jnp.dot(y_ref[...].astype(jnp.bfloat16), wo_ref[...],
                   preferred_element_type=jnp.float32)
         + bo_ref[...])
    o_ref[0] = _ln_core(z, gamma_ref[...], beta_ref[...])


def _ffn_ln_kernel(x_ref, w1_ref, b1_ref, w2_ref, b2_ref, g_ref, beta_ref, o_ref):
    """linear -> relu -> linear -> residual -> LayerNorm (bf16 MXU operands, f32 accumulation)."""
    x = x_ref[...]
    h = jnp.maximum(jnp.dot(x.astype(jnp.bfloat16), w1_ref[...],
                            preferred_element_type=jnp.float32) + b1_ref[...], 0.0)
    y = jnp.dot(h.astype(jnp.bfloat16), w2_ref[...],
                preferred_element_type=jnp.float32) + b2_ref[...]
    o_ref[...] = _ln_core(x + y, g_ref[...], beta_ref[...])


# ------------------------------------------------------------------
# Pallas wrappers
# ------------------------------------------------------------------

def _row_tiled_pallas(kernel, row_inputs, shared_inputs, out_cols, out_dtype=jnp.float32):
    """Row-independent kernels: row_inputs (M, C_i) tiled over M on a 'parallel' grid;
    shared_inputs (all 2D) broadcast to every tile."""
    m = row_inputs[0].shape[0]
    bm = _block_rows(m)
    in_specs = [pl.BlockSpec((bm, a.shape[1]), lambda i: (i, 0)) for a in row_inputs]
    in_specs += [pl.BlockSpec(a.shape, lambda i: (0, 0)) for a in shared_inputs]
    return pl.pallas_call(
        kernel,
        out_shape=jax.ShapeDtypeStruct((m, out_cols), out_dtype),
        grid=(m // bm,),
        in_specs=in_specs,
        out_specs=pl.BlockSpec((bm, out_cols), lambda i: (i, 0)),
        compiler_params=pltpu.CompilerParams(dimension_semantics=("parallel",)),
    )(*row_inputs, *shared_inputs)


def qkv_proj_pallas(x, pos, w, b, d_model):
    n, lq, _ = x.shape
    c = w.shape[1]
    out = _row_tiled_pallas(
        functools.partial(_qkv_kernel, d_model=d_model),
        [x.reshape(n * lq, d_model), pos.reshape(n * lq, d_model)],
        [w.astype(jnp.bfloat16), b.reshape(1, -1)],
        c,
    )
    return out.reshape(n, lq, c)


def self_attn_pallas(qkv, tgt, wo, bo, gamma, beta, n_heads):
    n, lq, d = tgt.shape
    tq = _seq_block(lq)
    kernel = functools.partial(_self_attn_kernel, n_heads=n_heads, d_model=d)
    return pl.pallas_call(
        kernel,
        out_shape=jax.ShapeDtypeStruct((n, lq, d), jnp.float32),
        grid=(n, lq // tq),
        in_specs=[
            pl.BlockSpec((1, tq, 3 * d), lambda b, q: (b, q, 0)),   # query rows
            pl.BlockSpec((1, lq, 3 * d), lambda b, q: (b, 0, 0)),   # full K/V
            pl.BlockSpec((1, tq, d), lambda b, q: (b, q, 0)),
            pl.BlockSpec((d, d), lambda b, q: (0, 0)),
            pl.BlockSpec((1, d), lambda b, q: (0, 0)),
            pl.BlockSpec((1, d), lambda b, q: (0, 0)),
            pl.BlockSpec((1, d), lambda b, q: (0, 0)),
        ],
        out_specs=pl.BlockSpec((1, tq, d), lambda b, q: (b, q, 0)),
        scratch_shapes=[pltpu.VMEM((tq, d), jnp.float32)],
        compiler_params=pltpu.CompilerParams(
            dimension_semantics=("parallel", "parallel"),
            vmem_limit_bytes=VMEM_LIMIT),
    )(qkv, qkv, tgt, wo.astype(jnp.bfloat16), bo.reshape(1, d),
      gamma.reshape(1, d), beta.reshape(1, d))


def value_proj_pallas(x, keep, w, b):
    n, s, d = x.shape
    out = _row_tiled_pallas(
        _masked_linear_kernel,
        [x.reshape(n * s, d).astype(jnp.bfloat16), keep.reshape(n * s, 1)],
        [w.astype(jnp.bfloat16), b.reshape(1, -1)],
        d, out_dtype=jnp.bfloat16,
    )
    return out.reshape(n, s, d)


def off_attn_proj_pallas(x, pos, w, b, n_heads, lp):
    n, lq, d = x.shape
    c = w.shape[1]
    grp = (jnp.arange(n_heads * lp)[:, None] // lp
           == jnp.arange(n_heads)[None, :]).astype(jnp.float32)      # (H*lp, H) block-diag ones
    out = _row_tiled_pallas(
        functools.partial(_off_attn_kernel, n_heads=n_heads, lp=lp),
        [x.reshape(n * lq, d), pos.reshape(n * lq, d)],
        [w.astype(jnp.bfloat16), b.reshape(1, -1), grp, grp.T],
        c,
    )
    return out.reshape(n, lq, c)


def ffn_pallas(x, w1, b1, w2, b2, gamma, beta):
    n, lq, d = x.shape
    out = _row_tiled_pallas(
        _ffn_ln_kernel,
        [x.reshape(n * lq, d)],
        [w1.astype(jnp.bfloat16), b1.reshape(1, -1), w2.astype(jnp.bfloat16), b2.reshape(1, -1),
         gamma.reshape(1, -1), beta.reshape(1, -1)],
        d,
    )
    return out.reshape(n, lq, d)


# ---- sparse deformable-attention core (glue: bilinear taps + gather; Pallas: aggregation) ----

def _bilinear_corner_weights(sampling_locations, attn_w, spatial_shapes, level_start_index):
    """Per-sample bilinear corners of F.grid_sample(bilinear, padding_mode='zeros',
    align_corners=False): flat indices into S plus (bilinear * attention) weights
    (0 for out-of-bounds corners). Returns (N,Lq,H,K) idx/wts with K = L*P*4."""
    g = 2.0 * sampling_locations - 1.0                                   # (N,Lq,H,L,P,2) (x,y)
    hs = spatial_shapes[:, 0].astype(jnp.float32)[None, None, None, :, None]
    ws = spatial_shapes[:, 1].astype(jnp.float32)[None, None, None, :, None]
    wi = spatial_shapes[:, 1][None, None, None, :, None]
    lsi = level_start_index[None, None, None, :, None]

    x = (g[..., 0] + 1.0) * 0.5 * ws - 0.5
    y = (g[..., 1] + 1.0) * 0.5 * hs - 0.5
    x0 = jnp.floor(x)
    y0 = jnp.floor(y)
    wx1 = x - x0
    wx0 = 1.0 - wx1
    wy1 = y - y0
    wy0 = 1.0 - wy1

    def corner(xc, yc, w):
        inb = (xc >= 0) & (xc <= ws - 1) & (yc >= 0) & (yc <= hs - 1)
        xi = jnp.clip(xc, 0, ws - 1).astype(jnp.int32)
        yi = jnp.clip(yc, 0, hs - 1).astype(jnp.int32)
        return lsi + yi * wi + xi, jnp.where(inb, w, 0.0)

    corners = [corner(x0, y0, wx0 * wy0), corner(x0 + 1, y0, wx1 * wy0),
               corner(x0, y0 + 1, wx0 * wy1), corner(x0 + 1, y0 + 1, wx1 * wy1)]
    idx = jnp.stack([c[0] for c in corners], axis=-1)                    # (N,Lq,H,L,P,4)
    wts = jnp.stack([c[1] for c in corners], axis=-1) * attn_w[..., None]
    n, lq, h = idx.shape[:3]
    k = idx.shape[3] * idx.shape[4] * idx.shape[5]
    return (idx.reshape(n, lq, h, k).astype(jnp.int32),
            wts.reshape(n, lq, h, k).astype(jnp.float32))


def _gather_taps(value, idx, n_heads, dh):
    """Lane-dense gather: out[n, q, k, h*dh:(h+1)*dh] = value[n, idx[n,q,h,k], h*dh:(h+1)*dh].
    No transposes of the big gathered tensor — heads stay concatenated on the lane axis."""
    n, s, _ = value.shape
    _, lq, h, k = idx.shape
    vh = value.reshape(n, s, n_heads, dh)                               # (N, S, H, Dh)
    idx2 = idx.transpose(0, 1, 3, 2).reshape(n, lq * k, n_heads)        # (N, Lq*K, H) (small)
    g = jnp.take_along_axis(vh, idx2[..., None], axis=1)                # (N, Lq*K, H, Dh)
    return g.reshape(n, lq, k, n_heads * dh)                            # (N, Lq, K, D)


def deform_core_pallas(value, sampling_locations, attn_w, spatial_shapes, level_start_index,
                       tgt, wo, bo, gamma, beta, n_heads):
    n, s, d = value.shape
    lq = tgt.shape[1]
    dh = d // n_heads
    idx, wts = _bilinear_corner_weights(sampling_locations, attn_w, spatial_shapes,
                                        level_start_index)
    k_pts = idx.shape[-1]                               # L * P * 4 sparse taps per query/head
    gv = _gather_taps(value, idx, n_heads, dh)          # (N, Lq, K, D) bf16
    w_t = wts.transpose(0, 1, 3, 2)                     # (N, Lq, K, H) f32 (small tensor)
    tlq = _seq_block(lq)
    kernel = functools.partial(_deform_agg_kernel, n_heads=n_heads)
    return pl.pallas_call(
        kernel,
        out_shape=jax.ShapeDtypeStruct((n, lq, d), jnp.float32),
        grid=(n, lq // tlq),
        in_specs=[
            pl.BlockSpec((1, tlq, k_pts, d), lambda b, q: (b, q, 0, 0)),
            pl.BlockSpec((1, tlq, k_pts, n_heads), lambda b, q: (b, q, 0, 0)),
            pl.BlockSpec((1, tlq, d), lambda b, q: (b, q, 0)),
            pl.BlockSpec((d, d), lambda b, q: (0, 0)),
            pl.BlockSpec((1, d), lambda b, q: (0, 0)),
            pl.BlockSpec((1, d), lambda b, q: (0, 0)),
            pl.BlockSpec((1, d), lambda b, q: (0, 0)),
        ],
        out_specs=pl.BlockSpec((1, tlq, d), lambda b, q: (b, q, 0)),
        scratch_shapes=[pltpu.VMEM((tlq, d), jnp.float32)],
        compiler_params=pltpu.CompilerParams(
            dimension_semantics=("parallel", "parallel"),
            vmem_limit_bytes=VMEM_LIMIT),
    )(gv, w_t, tgt, wo.astype(jnp.bfloat16), bo.reshape(1, d),
      gamma.reshape(1, d), beta.reshape(1, d))


OPS_PALLAS = dict(
    qkv_proj=qkv_proj_pallas,
    self_attn=self_attn_pallas,
    value_proj=value_proj_pallas,
    off_attn_proj=off_attn_proj_pallas,
    deform_core=deform_core_pallas,
    ffn=ffn_pallas,
)


# ------------------------------------------------------------------
# Pure-JAX reference ops (mirror the bf16 matmul-operand policy; deform uses the dense
# one-hot grid_sample formulation, correctness check only)
# ------------------------------------------------------------------

_BF = jnp.bfloat16
_HI = jax.lax.Precision.HIGHEST


def _qkv_ref(x, pos, w, b, d_model):
    wb = w.astype(_BF)
    xp = (x + pos).astype(_BF)
    xb = x.astype(_BF)
    qk = jnp.dot(xp, wb[:, :2 * d_model], preferred_element_type=jnp.float32) + b[:2 * d_model]
    v = jnp.dot(xb, wb[:, 2 * d_model:], preferred_element_type=jnp.float32) + b[2 * d_model:]
    return jnp.concatenate([qk, v], axis=-1)


def _self_attn_ref(qkv, tgt, wo, bo, gamma, beta, n_heads):
    n, lq, d3 = qkv.shape
    d = d3 // 3
    dh = d // n_heads

    def heads(t):
        return t.reshape(n, lq, n_heads, dh).transpose(0, 2, 1, 3)

    q = heads(qkv[..., :d]).astype(_BF)
    k = heads(qkv[..., d:2 * d]).astype(_BF)
    v = heads(qkv[..., 2 * d:]).astype(_BF)
    s = jnp.einsum("nhqd,nhkd->nhqk", q, k, preferred_element_type=jnp.float32) * (float(dh) ** -0.5)
    p = jax.nn.softmax(s, axis=-1)
    o = jnp.einsum("nhqk,nhkd->nhqd", p.astype(_BF), v, preferred_element_type=jnp.float32)
    o = o.transpose(0, 2, 1, 3).reshape(n, lq, d)
    proj = jnp.dot(o.astype(_BF), wo.astype(_BF), preferred_element_type=jnp.float32)
    return _ln_core(tgt + proj + bo, gamma, beta)


def _value_proj_ref(x, keep, w, b):
    y = jnp.dot(x.astype(_BF), w.astype(_BF), preferred_element_type=jnp.float32) + b
    return (y * keep).astype(_BF)


def _off_attn_ref(x, pos, w, b, n_heads, lp):
    raw = jnp.dot((x + pos).astype(_BF), w.astype(_BF),
                  preferred_element_type=jnp.float32) + b
    off_cols = 2 * n_heads * lp
    off = raw[..., :off_cols]
    aw = raw[..., off_cols:]
    lead = aw.shape[:-1]
    aw = jax.nn.softmax(aw.reshape(*lead, n_heads, lp), axis=-1).reshape(*lead, n_heads * lp)
    return jnp.concatenate([off, aw], axis=-1)


def _dense_sampling_matrix(sampling_locations, attn_w, spatial_shapes, level_start_index, s_total):
    g = 2.0 * sampling_locations - 1.0
    hs = spatial_shapes[:, 0].astype(jnp.float32)[None, None, None, :, None]
    ws = spatial_shapes[:, 1].astype(jnp.float32)[None, None, None, :, None]
    wi = spatial_shapes[:, 1][None, None, None, :, None]
    lsi = level_start_index[None, None, None, :, None]

    x = (g[..., 0] + 1.0) * 0.5 * ws - 0.5
    y = (g[..., 1] + 1.0) * 0.5 * hs - 0.5
    x0 = jnp.floor(x)
    y0 = jnp.floor(y)
    wx1 = x - x0
    wx0 = 1.0 - wx1
    wy1 = y - y0
    wy0 = 1.0 - wy1

    def corner(xc, yc, w):
        inb = (xc >= 0) & (xc <= ws - 1) & (yc >= 0) & (yc <= hs - 1)
        xi = jnp.clip(xc, 0, ws - 1).astype(jnp.int32)
        yi = jnp.clip(yc, 0, hs - 1).astype(jnp.int32)
        return lsi + yi * wi + xi, jnp.where(inb, w, 0.0)

    corners = [corner(x0, y0, wx0 * wy0), corner(x0 + 1, y0, wx1 * wy0),
               corner(x0, y0 + 1, wx0 * wy1), corner(x0 + 1, y0 + 1, wx1 * wy1)]
    idx = jnp.stack([c[0] for c in corners], axis=-1)
    wts = jnp.stack([c[1] for c in corners], axis=-1) * attn_w[..., None]
    onehot = jax.nn.one_hot(idx, s_total, dtype=jnp.float32)
    return jnp.einsum("nqhlpc,nqhlpcs->nhqs", wts, onehot, precision=_HI)


def _deform_core_ref(value, sampling_locations, attn_w, spatial_shapes, level_start_index,
                     tgt, wo, bo, gamma, beta, n_heads):
    n, s, d = value.shape
    lq = tgt.shape[1]
    dh = d // n_heads
    wmat = _dense_sampling_matrix(sampling_locations, attn_w, spatial_shapes,
                                  level_start_index, s)
    vh = value.astype(jnp.float32).reshape(n, s, n_heads, dh).transpose(0, 2, 1, 3)
    out = jnp.einsum("nhqs,nhsd->nhqd", wmat, vh, precision=_HI)
    out = out.transpose(0, 2, 1, 3).reshape(n, lq, d)
    proj = jnp.dot(out.astype(_BF), wo.astype(_BF), preferred_element_type=jnp.float32)
    return _ln_core(tgt + proj + bo, gamma, beta)


def _ffn_ref(x, w1, b1, w2, b2, gamma, beta):
    h = jnp.maximum(jnp.dot(x.astype(_BF), w1.astype(_BF),
                            preferred_element_type=jnp.float32) + b1, 0.0)
    y = jnp.dot(h.astype(_BF), w2.astype(_BF), preferred_element_type=jnp.float32) + b2
    return _ln_core(x + y, gamma, beta)


OPS_REF = dict(
    qkv_proj=_qkv_ref,
    self_attn=_self_attn_ref,
    value_proj=_value_proj_ref,
    off_attn_proj=_off_attn_ref,
    deform_core=_deform_core_ref,
    ffn=_ffn_ref,
)


# ------------------------------------------------------------------
# Decoder layer / decoder loop (layout glue in plain JAX)
# ------------------------------------------------------------------

def decoder_layer_forward(ops, p, tgt, query_pos, reference_points, src,
                          spatial_shapes, level_start_index, padding_mask,
                          n_heads, n_levels, n_points):
    n, lq, d = tgt.shape
    s = src.shape[1]
    hlp = n_heads * n_levels * n_points
    pos = jnp.zeros_like(tgt) if query_pos is None else query_pos

    # ---- self attention (fused qkv matmul; q,k from tgt+pos, v from tgt) ----
    wqkv = jnp.concatenate([p["q"][0], p["k"][0], p["v"][0]], axis=1)
    bqkv = jnp.concatenate([p["q"][1], p["k"][1], p["v"][1]], axis=0)
    qkv = ops["qkv_proj"](tgt, pos, wqkv, bqkv, d)
    tgt = ops["self_attn"](qkv, tgt, p["attn_out"][0], p["attn_out"][1],
                           p["ln2"][0], p["ln2"][1], n_heads)

    # ---- cross attention (MSDeformAttn) ----
    keep = (jnp.ones((n, s, 1), jnp.float32) if padding_mask is None
            else (1.0 - padding_mask.astype(jnp.float32))[..., None])
    value = ops["value_proj"](src, keep, p["value_proj"][0], p["value_proj"][1])

    w_oa = jnp.concatenate([p["sampling_offsets"][0], p["attention_weights"][0]], axis=1)
    b_oa = jnp.concatenate([p["sampling_offsets"][1], p["attention_weights"][1]], axis=0)
    raw = ops["off_attn_proj"](tgt, pos, w_oa, b_oa, n_heads, n_levels * n_points)
    off = raw[..., :2 * hlp].reshape(n, lq, n_heads, n_levels, n_points, 2)
    attn_w = raw[..., 2 * hlp:].reshape(n, lq, n_heads, n_levels, n_points)

    offset_normalizer = jnp.stack([spatial_shapes[:, 1], spatial_shapes[:, 0]], -1).astype(jnp.float32)
    sampling_locations = (reference_points[:, :, None, :, None, :]
                          + off / offset_normalizer[None, None, None, :, None, :])

    tgt = ops["deform_core"](value, sampling_locations, attn_w, spatial_shapes, level_start_index,
                             tgt, p["output_proj"][0], p["output_proj"][1],
                             p["ln1"][0], p["ln1"][1], n_heads)

    # ---- ffn ----
    tgt = ops["ffn"](tgt, p["lin1"][0], p["lin1"][1], p["lin2"][0], p["lin2"][1],
                     p["ln3"][0], p["ln3"][1])
    return tgt


def deformable_transformer_decoder(ops, layer_params_list, X, reference_points, X_enc,
                                   enc_spatial_dim, enc_level_start_index, enc_valid_ratios,
                                   query_pos=None, enc_padding_mask=None,
                                   n_heads=4, n_levels=2, n_points=2, return_intermediate=False):
    output = X
    intermediate = []
    intermediate_reference_points = []
    for p in layer_params_list:
        assert reference_points.shape[-1] == 2
        reference_points_input = reference_points[:, :, None, :] * enc_valid_ratios[:, None, :, :]
        output = decoder_layer_forward(ops, p, output, query_pos, reference_points_input,
                                       X_enc, enc_spatial_dim, enc_level_start_index,
                                       enc_padding_mask, n_heads, n_levels, n_points)
        if return_intermediate:
            intermediate.append(output)
            intermediate_reference_points.append(reference_points)
    if return_intermediate:
        return jnp.stack(intermediate), jnp.stack(intermediate_reference_points)
    return output, reference_points


# ------------------------------------------------------------------
# Deterministic parameter init (shapes per Deformable-DETR decoder layer)
# ------------------------------------------------------------------

def init_params(key, d_model, n_heads, n_levels, n_points, d_ffn, num_layers):
    def dense(k, fan_in, fan_out, scale=0.05):
        k1, k2 = jax.random.split(k)
        w = scale * jax.random.normal(k1, (fan_in, fan_out), jnp.float32)
        b = scale * jax.random.normal(k2, (fan_out,), jnp.float32)
        return w, b

    ks = jax.random.split(key, 10)
    layer = dict(
        q=dense(ks[0], d_model, d_model),
        k=dense(ks[1], d_model, d_model),
        v=dense(ks[2], d_model, d_model),
        attn_out=dense(ks[3], d_model, d_model),
        ln2=(jnp.ones((d_model,), jnp.float32), jnp.zeros((d_model,), jnp.float32)),
        value_proj=dense(ks[4], d_model, d_model),
        sampling_offsets=dense(ks[5], d_model, n_heads * n_levels * n_points * 2),
        attention_weights=dense(ks[6], d_model, n_heads * n_levels * n_points),
        output_proj=dense(ks[7], d_model, d_model),
        ln1=(jnp.ones((d_model,), jnp.float32), jnp.zeros((d_model,), jnp.float32)),
        lin1=dense(ks[8], d_model, d_ffn),
        lin2=dense(ks[9], d_ffn, d_model),
        ln3=(jnp.ones((d_model,), jnp.float32), jnp.zeros((d_model,), jnp.float32)),
    )
    # create_layers deep-copies one already-initialized layer -> identical params per layer
    return [layer] * num_layers


# ------------------------------------------------------------------
if __name__ == "__main__":
    key = jax.random.PRNGKey(0)
    N, Lq, D = 2, 8, 32
    n_heads, n_levels, n_points = 4, 2, 2
    d_ffn, num_layers = 64, 2

    enc_spatial_dim = jnp.array([[8, 8], [4, 4]], jnp.int32)          # (L, 2) as (H, W)
    enc_level_start_index = jnp.array([0, 64], jnp.int32)
    S = 8 * 8 + 4 * 4

    ks = jax.random.split(key, 8)
    X = jax.random.normal(ks[0], (N, Lq, D), jnp.float32)
    X_enc = jax.random.normal(ks[1], (N, S, D), jnp.float32)
    reference_points = jax.random.uniform(ks[2], (N, Lq, 2), jnp.float32)
    enc_valid_ratios = jax.random.uniform(ks[3], (N, n_levels, 2), jnp.float32, 0.5, 1.0)
    query_pos = jax.random.normal(ks[4], (N, Lq, D), jnp.float32)
    enc_padding_mask = jax.random.uniform(ks[5], (N, S)) < 0.1        # bool padding mask
    params = init_params(ks[6], D, n_heads, n_levels, n_points, d_ffn, num_layers)

    run = functools.partial(
        deformable_transformer_decoder,
        layer_params_list=params,
        X=X,
        reference_points=reference_points,
        X_enc=X_enc,
        enc_spatial_dim=enc_spatial_dim,
        enc_level_start_index=enc_level_start_index,
        enc_valid_ratios=enc_valid_ratios,
        query_pos=query_pos,
        enc_padding_mask=enc_padding_mask,
        n_heads=n_heads,
        n_levels=n_levels,
        n_points=n_points,
        return_intermediate=False,
    )

    out, ref_pts = run(OPS_PALLAS)
    out = jax.block_until_ready(out)

    out_ref, _ = run(OPS_REF)
    assert out.shape == (N, Lq, D)
    assert jnp.array_equal(ref_pts, reference_points)
    assert bool(jnp.all(jnp.isfinite(out)))
    # bf16 MXU operands (f32 accumulation) + approx-reciprocal softmax -> 1e-2 tolerance
    assert bool(jnp.allclose(out, out_ref, atol=1e-2, rtol=1e-2)), (
        "mismatch vs JAX reference: max abs diff = "
        + str(float(jnp.max(jnp.abs(out - out_ref))))
    )
    print("KERNEL_OK")
</pallas_src>

<mosaic_0001>
module attributes {stable_mosaic.version = 11 : i64} {
  func.func @_qkv_kernel(%arg0: i32, %arg1: memref<16x32xf32, #tpu.memory_space<vmem>>, %arg2: memref<16x32xf32, #tpu.memory_space<vmem>>, %arg3: memref<32x96xbf16, #tpu.memory_space<vmem>>, %arg4: memref<1x96xf32, #tpu.memory_space<vmem>>, %arg5: memref<16x96xf32, #tpu.memory_space<vmem>>) attributes {dimension_semantics = [#tpu.dimension_semantics<parallel>], iteration_bounds = array<i64: 1>, scalar_prefetch = 0 : i64, scratch_operands = 0 : i64, tpu.core_type = #tpu.core_type<tc>, window_params = [{transform_indices = @transform_0, window_bounds = array<i64: 16, 32>}, {transform_indices = @transform_1, window_bounds = array<i64: 16, 32>}, {pipeline_mode = #tpu.pipeline_mode<synchronous>, transform_indices = @transform_2, window_bounds = array<i64: 32, 96>}, {pipeline_mode = #tpu.pipeline_mode<synchronous>, transform_indices = @transform_3, window_bounds = array<i64: 1, 96>}, {transform_indices = @transform_4, window_bounds = array<i64: 16, 96>}]} {
    %c0 = arith.constant 0 : index
    %c0_0 = arith.constant 0 : index
    %0 = vector.load %arg1[%c0, %c0_0] : memref<16x32xf32, #tpu.memory_space<vmem>>, vector<16x32xf32>
    %c0_1 = arith.constant 0 : index
    %c0_2 = arith.constant 0 : index
    %1 = vector.load %arg2[%c0_1, %c0_2] : memref<16x32xf32, #tpu.memory_space<vmem>>, vector<16x32xf32>
    %2 = arith.addf %0, %1 : vector<16x32xf32>
    %3 = arith.truncf %2 : vector<16x32xf32> to vector<16x32xbf16>
    %4 = arith.truncf %0 : vector<16x32xf32> to vector<16x32xbf16>
    %c0_3 = arith.constant 0 : index
    %c0_4 = arith.constant 0 : index
    %5 = vector.load %arg3[%c0_3, %c0_4] : memref<32x96xbf16, #tpu.memory_space<vmem>>, vector<32x96xbf16>
    %c0_5 = arith.constant 0 : index
    %c0_6 = arith.constant 0 : index
    %6 = vector.load %arg4[%c0_5, %c0_6] : memref<1x96xf32, #tpu.memory_space<vmem>>, vector<1x96xf32>
    %7 = vector.extract_strided_slice %5 {offsets = [0, 0], sizes = [32, 64], strides = [1, 1]} : vector<32x96xbf16> to vector<32x64xbf16>
    %cst = arith.constant dense<0.000000e+00> : vector<16x64xf32>
    %8 = tpu.matmul %3, %7, %cst {dimension_numbers = #tpu.dot_dimension_numbers<[1], [0], [0], [1], [0, 0, 1, 1], [], []>} : vector<16x32xbf16>, vector<32x64xbf16>, vector<16x64xf32> -> vector<16x64xf32>
    %9 = vector.extract_strided_slice %6 {offsets = [0, 0], sizes = [1, 64], strides = [1, 1]} : vector<1x96xf32> to vector<1x64xf32>
    %10 = vector.broadcast %9 : vector<1x64xf32> to vector<16x64xf32>
    %11 = arith.addf %8, %10 : vector<16x64xf32>
    %12 = vector.extract_strided_slice %5 {offsets = [0, 64], sizes = [32, 32], strides = [1, 1]} : vector<32x96xbf16> to vector<32x32xbf16>
    %cst_7 = arith.constant dense<0.000000e+00> : vector<16x32xf32>
    %13 = tpu.matmul %4, %12, %cst_7 {dimension_numbers = #tpu.dot_dimension_numbers<[1], [0], [0], [1], [0, 0, 1, 1], [], []>} : vector<16x32xbf16>, vector<32x32xbf16>, vector<16x32xf32> -> vector<16x32xf32>
    %14 = vector.extract_strided_slice %6 {offsets = [0, 64], sizes = [1, 32], strides = [1, 1]} : vector<1x96xf32> to vector<1x32xf32>
    %15 = vector.broadcast %14 : vector<1x32xf32> to vector<16x32xf32>
    %16 = arith.addf %13, %15 : vector<16x32xf32>
    %c0_8 = arith.constant 0 : index
    %c0_9 = arith.constant 0 : index
    %17 = vector.load %arg5[%c0_8, %c0_9] : memref<16x96xf32, #tpu.memory_space<vmem>>, vector<16x64xf32>
    tpu.vector_store %arg5[%c0_8, %c0_9], %11 {strides = array<i32>} : memref<16x96xf32, #tpu.memory_space<vmem>>, vector<16x64xf32>,
    %c0_10 = arith.constant 0 : index
    %c64 = arith.constant 64 : index
    %18 = vector.load %arg5[%c0_10, %c64] : memref<16x96xf32, #tpu.memory_space<vmem>>, vector<16x32xf32>
    tpu.vector_store %arg5[%c0_10, %c64], %16 {strides = array<i32>} : memref<16x96xf32, #tpu.memory_space<vmem>>, vector<16x32xf32>,
    return
  }
  func.func @transform_0(%arg0: i32) -> (i32, i32) {
    %c0_i32 = arith.constant 0 : i32
    %c0_i32_0 = arith.constant 0 : i32
    return %arg0, %c0_i32 : i32, i32
  }
  func.func @transform_1(%arg0: i32) -> (i32, i32) {
    %c0_i32 = arith.constant 0 : i32
    %c0_i32_0 = arith.constant 0 : i32
    return %arg0, %c0_i32 : i32, i32
  }
  func.func @transform_2(%arg0: i32) -> (i32, i32) {
    %c0_i32 = arith.constant 0 : i32
    %c0_i32_0 = arith.constant 0 : i32
    %c0_i32_1 = arith.constant 0 : i32
    return %c0_i32, %c0_i32_0 : i32, i32
  }
  func.func @transform_3(%arg0: i32) -> (i32, i32) {
    %c0_i32 = arith.constant 0 : i32
    %c0_i32_0 = arith.constant 0 : i32
    %c0_i32_1 = arith.constant 0 : i32
    return %c0_i32, %c0_i32_0 : i32, i32
  }
  func.func @transform_4(%arg0: i32) -> (i32, i32) {
    %c0_i32 = arith.constant 0 : i32
    %c0_i32_0 = arith.constant 0 : i32
    return %arg0, %c0_i32 : i32, i32
  }
}

</mosaic_0001>

<bundles_post_ra>
// kernel: tpu_custom_call.1
= control target key start
LH: loop header
LB: loop body
LE: loop exit
PB: predicated region body
PF: predicated region fallthrough
CT: control target
= control target key end

     0   :  { %9 = vsyncpa [#allocation3], 0  ;;  %s463_s0 = inlined_call_operand.hbm [shape: f32[16,32], index: 0, kind: input, shape index: {}]   ;;  %s464_s1 = inlined_call_operand.hbm [shape: f32[16,32], index: 1, kind: input, shape index: {}]   ;;  %s465_s2 = inlined_call_operand.hbm [shape: bf16[32,96], index: 2, kind: input, shape index: {}]   ;;  %s466_s3 = inlined_call_operand.vmem [shape: f32[1,96], index: 3, kind: input, shape index: {}]   ;;  %s467_s4 = inlined_call_operand.hbm [shape: f32[16,96], index: 4, kind: output, shape index: {}]  }
   0x1   :  { %10 = vsyncpa [#allocation6], 0 }
   0x2   :  { %11 = vsyncpa [#allocation4], 0  ;;  %s354_s15 = smov [#allocation5]   ;;  %s355_s17 = smov [#allocation2]  }
   0x3   :  { %s29_s16 = sshll.u32 %s354_s15, 4  ;;  %s17_s18 = sshll.u32 %s355_s17, 4  ;;  %s30_s16 = int_to_ptr.vmem [resolvable:$true] %s29_s16  ;;  %s389_s18 = int_to_ptr.vmem [resolvable:$true] %s17_s18 }
   0x4   :  { %s260_s21 = scalar_lea.hbm %s464_s1, 256 }
   0x5   :  { %p261_p0 = scmp.ne.s32.totalorder %s464_s1, %s260_s21  ;;  %p264_p1 = scmp.lt.u32.totalorder %s260_s21, %s464_s1 }
   0x7   :  { %p266_p2 = pnand %p264_p1, %p261_p0 }
   0x9   :  { %269 = shalt.err (!%p266_p2)
}
   0xa   :  { %s270_s26 = scalar_lea.vmem %s30_s16, 256  ;;  %p275_p4 = scmp.lt.s32.totalorder %s30_s16, %s30_s16 }
   0xb   :  { %p271_p3 = scmp.ne.s32.totalorder %s30_s16, %s270_s26  ;;  %p276_p5 = scmp.lt.s32.totalorder %s270_s26, %s270_s26 }
   0xd   :  { %p277_p6 = por %p276_p5, %p275_p4 }
   0xf   :  { %p278_p7 = pnand %p277_p6, %p271_p3 }
  0x11   :  { %281 = shalt.err (!%p278_p7)
}
  0x12   :  { %s356_s27 = smov 128   ;;  %s357_s28 = smov 8  }
  0x13   :  { %35 = dma.hbm_to_vmem [thread:$0]  %s464_s1, 256, %s30_s16, [#allocation6], %s356_s27, %s356_s27, %s357_s28  }
  0x14   :  { %s282_s7 = scalar_lea.hbm %s463_s0, 256 }
  0x15   :  { %p283_p8 = scmp.ne.s32.totalorder %s463_s0, %s282_s7  ;;  %p286_p9 = scmp.lt.u32.totalorder %s282_s7, %s463_s0 }
  0x17   :  { %p288_p10 = pnand %p286_p9, %p283_p8 }
  0x19   :  { %291 = shalt.err (!%p288_p10)
}
  0x1a   :  { %s292_s12 = scalar_lea.vmem %s389_s18, 256  ;;  %p297_p12 = scmp.lt.s32.totalorder %s389_s18, %s389_s18 }
  0x1b   :  { %p293_p11 = scmp.ne.s32.totalorder %s389_s18, %s292_s12  ;;  %p298_p13 = scmp.lt.s32.totalorder %s292_s12, %s292_s12 }
  0x1d   :  { %p299_p0 = por %p298_p13, %p297_p12 }
  0x1f   :  { %p300_p1 = pnand %p299_p0, %p293_p11 }
  0x21   :  { %303 = shalt.err (!%p300_p1)
}
  0x22   :  { %23 = dma.hbm_to_vmem [thread:$0]  %s463_s0, 256, %s389_s18, [#allocation3], %s356_s27, %s356_s27, %s357_s28  }
  0x23   :  { %s358_s14 = smov [#allocation7]   ;;  %s304_s19 = scalar_lea.hbm %s465_s2, 256 }
  0x24   :  { %s41_s15 = sshll.u32 %s358_s14, 4  ;;  %p305_p2 = scmp.ne.s32.totalorder %s465_s2, %s304_s19  ;;  %s42_s15 = int_to_ptr.vmem [resolvable:$true] %s41_s15 }
  0x25   :  { %p308_p3 = scmp.lt.u32.totalorder %s304_s19, %s465_s2 }
  0x27   :  { %p310_p4 = pnand %p308_p3, %p305_p2 }
  0x29   :  { %313 = shalt.err (!%p310_p4)
}
  0x2a   :  { %s314_s24 = scalar_lea.vmem %s42_s15, 256  ;;  %p319_p6 = scmp.lt.s32.totalorder %s42_s15, %s42_s15 }
  0x2b   :  { %p315_p5 = scmp.ne.s32.totalorder %s42_s15, %s314_s24  ;;  %p320_p7 = scmp.lt.s32.totalorder %s314_s24, %s314_s24 }
  0x2d   :  { %p321_p8 = por %p320_p7, %p319_p6 }
  0x2f   :  { %p322_p9 = pnand %p321_p8, %p315_p5 }
  0x31   :  { %325 = shalt.err (!%p322_p9)
}
  0x32   :  { %s359_s0 = smov 64   ;;  %s360_s18 = smov 4  }
  0x33   :  { %47 = dma.hbm_to_vmem [thread:$0]  %s465_s2, 256, %s42_s15, [#allocation6], %s359_s0, %s359_s0, %s360_s18  }
  0x34   :  { %348 = dma.done.wait [#allocation3], 256  }
  0x35   :  { %349 = vsyncadd [#allocation3], 4294967040 }
  0x36   :  { %350 = dma.done.wait [#allocation6], 512  }
  0x37   :  { %351 = vsyncadd [#allocation6], 4294966784  ;;  %v361_v0 = vmov 0.0   ;;  %vm362_vm0 = vmmov 0   ;;  %v258_v1 = vld [vmem:[#allocation7] sm:$0xff]   ;;  %v259_v2 = vld [vmem:[#allocation7 + $0x8] sm:$0xff]  }
  0x38   :  { %240 = vmatprep.subr.bf16.mxu1 %v361_v0  ;;  %244 = vmatprep.mubr.msk.bf16.mxu1 %vm362_vm0, %v361_v0  ;;  %v60_v3 = vld [vmem:[#allocation2] sm:$0xff]  ;;  %v61_v4 = vld [vmem:[#allocation2 + $0x8] sm:$0xff]  ;;  %v62_v7 = vld [vmem:[#allocation5] sm:$0xff]  ;;  %vm91_vm1 = vcmask 261120   ;;  %vm189_vm2 = vcmask 523264   ;;  %vm200_vm3 = vcmask 785920  }
  0x39   :  { %232 = vmatprep.subr.bf16.mxu0 %v361_v0  ;;  %236 = vmatprep.mubr.msk.bf16.mxu0 %vm362_vm0, %v361_v0  ;;  %v221_v5 = vld [vmem:[%s466_s3] ss:$0 sm:$0xff]  ;;  %v67_v6 = vpack.c.bf16 %v61_v4, %v60_v3  ;;  %v63_v8 = vld [vmem:[#allocation5 + $0x8] sm:$0xff]  ;;  %v64_v9 = vadd.f32 %v62_v7, %v60_v3  ;;  %s363_s2 = smov [#allocation8]  }
  0x3a   :  { %136 = vrot.lane.b32.xlu0 %v258_v1, %s359_s0  ;;  %233 = vmatpush3.bf16.msra.mxu0 %v258_v1  ;;  %v65_v10 = vadd.f32 %v63_v8, %v61_v4  ;;  %s208_s3 = sshll.u32 %s363_s2, 4  ;;  %s209_s3 = int_to_ptr.vmem [resolvable:$true] %s208_s3 }
  0x3b   :  { %142 = vrot.lane.b32.xlu1 %v221_v5, %s359_s0  ;;  %234 = vmatprep.subr.bf16.mxu0 %v361_v0  ;;  %s326_s5 = scalar_lea.vmem %s209_s3, 256  ;;  %p331_p11 = scmp.lt.s32.totalorder %s209_s3, %s209_s3 }
  0x3c   :  { %v66_v11 = vpack.c.bf16 %v65_v10, %v64_v9  ;;  %p327_p10 = scmp.ne.s32.totalorder %s209_s3, %s326_s5  ;;  %p332_p12 = scmp.lt.s32.totalorder %s326_s5, %s326_s5 }
  0x3e   :  { %138 = vrot.lane.b32.xlu0 %v259_v2, %s359_s0  ;;  %235 = vmatpush3.bf16.msra.mxu0 %v259_v2  ;;  %p333_p13 = por %p332_p12, %p331_p11 }
  0x40   :  { %p334_p0 = pnand %p333_p13, %p327_p10 }
  0x41   :  { %237 = vmatmul.mubr.msk.bf16.vlgmr.msra.gmra.mrb[0].mxu0 %vm91_vm1, %v66_v11 }
  0xac   :  { %v137_v12 = vpop.permute.xlu0 %136 }
  0xad   :  { %241 = vmatpush3.bf16.msra.mxu1 %v137_v12  ;;  %v143_v20 = vpop.permute.xlu1 %142 }
  0xae   :  { %242 = vmatprep.subr.bf16.mxu1 %v361_v0 }
  0xb0   :  { %v139_v13 = vpop.permute.xlu0 %138 }
  0xb1   :  { %243 = vmatpush3.bf16.msra.mxu1 %v139_v13 }
  0xb4   :  { %245 = vmatmul.mubr.msk.bf16.vlgmr.msra.gmra.mrb[0].mxu1 %vm91_vm1, %v67_v6 }
 0x114   :  { %v129_v14 = vpop.f32.mrb[0].mxu0 }
 0x115   :  { %v130_v15 = vadd.f32 %v221_v5, %v129_v14  ;;  %v238_v16 = vpop.f32.mrb[1].mxu0 }
 0x116   :  { %v132_v17 = vpop.f32.mrb[2].mxu0 }
 0x117   :  { %190 = vst.msk [vmem:[#allocation8] sm:$0xff] %vm189_vm2, %v130_v15  ;;  %v133_v18 = vadd.f32 %v221_v5, %v132_v17  ;;  %v239_v19 = vpop.f32.mrb[3].mxu0 }
 0x119   :  { %191 = vst.msk [vmem:[#allocation8 + $0x8] sm:$0xff] %vm189_vm2, %v133_v18 }
 0x187   :  { %v182_v21 = vpop.f32.mrb[0].mxu1 }
 0x188   :  { %v183_v22 = vadd.f32 %v182_v21, %v143_v20  ;;  %v246_v23 = vpop.f32.mrb[1].mxu1 }
 0x189   :  { %v185_v24 = vpop.f32.mrb[2].mxu1 }
 0x18a   :  { %v186_v25 = vadd.f32 %v185_v24, %v143_v20  ;;  %194 = vrot.lane.b32.xlu1 %v183_v22, %s359_s0  ;;  %v247_v26 = vpop.f32.mrb[3].mxu1 }
 0x18c   :  { %196 = vrot.lane.b32.xlu0 %v186_v25, %s359_s0 }
 0x1fc   :  { %v195_v27 = vpop.permute.xlu1 %194 }
 0x1fd   :  { %201 = vst.msk [vmem:[#allocation8] sm:$0xff] %vm200_vm3, %v195_v27 }
 0x1fe   :  { %v197_v28 = vpop.permute.xlu0 %196 }
 0x1ff   :  { %202 = vst.msk [vmem:[#allocation8 + $0x8] sm:$0xff] %vm200_vm3, %v197_v28 }
 0x200   :  { %337 = shalt.err (!%p334_p0)
}
 0x201   :  { %s338_s8 = scalar_lea.hbm %s467_s4, 256 }
 0x202   :  { %p339_p1 = scmp.ne.s32.totalorder %s467_s4, %s338_s8  ;;  %p342_p2 = scmp.lt.u32.totalorder %s338_s8, %s467_s4 }
 0x204   :  { %p344_p3 = pnand %p342_p2, %p339_p1 }
 0x206   :  { %347 = shalt.err (!%p344_p3)
}
 0x207   :  { %214 = dma.vmem_to_hbm [thread:$0]  %s209_s3, 256, %s467_s4, [#allocation4], %s356_s27, %s356_s27, %s357_s28  }
 0x208   :  { %352 = dma.done.wait [#allocation4], 256  }
 0x209   :  { %353 = vsyncadd [#allocation4], 4294967040 }
 0x20a   :  { %218 = vsyncpa [#allocation3], 1 }
 0x20b   :  { %219 = vsyncpa [#allocation6], 1 }
 0x20c   :  { %220 = vsyncpa [#allocation4], 1 }

</bundles_post_ra>
